<compile_context>
chip_gen: v6e
topology: v6e:2x2x1
jax: 0.10.0
libtpu: 0.0.40
codegen_flags: <defaults>
</compile_context>

<pallas_src>
import functools
import math

import jax
import jax.numpy as jnp
from jax.experimental import pallas as pl
from jax.experimental.pallas import tpu as pltpu

block_size = 8
n_embd = 32
vocab_size = 65          # synthetic char-level vocab (e.g. tiny-shakespeare)
V_PAD = 128              # vocab padded to a full 128-lane width
NEG_INF = -1e30          # bias for padded vocab columns (kills them in logsumexp)


def bigram_kernel(idx_ref, tgt_ref, tok_ref, pos_ref, w_ref, b_ref,
                  logits_ref, loss_ref, *, n_valid_rows):
    # idx_ref:  (R, 1)      int32   token ids for this row tile
    # tgt_ref:  (R, 1)      int32   targets for this row tile
    # tok_ref:  (V_PAD, C)  bf16    token embedding table (rows >= vocab are 0)
    # pos_ref:  (T, C)      bf16    position embedding table (first T rows)
    # w_ref:    (C, V_PAD)  bf16    lm_head weight (cols >= vocab are 0)
    # b_ref:    (1, V_PAD)  f32     lm_head bias (cols >= vocab are -1e30)
    # logits_ref: (R, V_PAD) f32    lane-dense logits output
    # loss_ref:   (R, 1)     f32    per-row CE (0 for padded rows)
    R = idx_ref.shape[0]
    Vp, C = tok_ref.shape
    T = pos_ref.shape[0]

    idx = idx_ref[...]                                            # (R, 1)
    col = jax.lax.broadcasted_iota(jnp.int32, (R, Vp), 1)         # (R, 128)
    onehot = (idx == col).astype(tok_ref.dtype)                   # bf16, exact 0/1

    # token embedding gather as a bf16 MXU matmul with f32 accumulation
    tok_emb = jnp.dot(onehot, tok_ref[...],
                      preferred_element_type=jnp.float32)         # (R, C) f32

    # positional broadcast-add (no jnp.tile); wrapper guarantees R % T == 0
    pos = pos_ref[...].astype(jnp.float32)                        # (T, C)
    x = (tok_emb.reshape(R // T, T, C) + pos[None, :, :]).reshape(R, C)

    # lm_head: bf16 MXU matmul, f32 accumulate, f32 bias
    logits = jnp.dot(x.astype(w_ref.dtype), w_ref[...],
                     preferred_element_type=jnp.float32) + b_ref[...]
    logits_ref[...] = logits                                      # lane-dense store

    # cross-entropy per row, all in f32 (padded columns suppressed by -1e30 bias)
    m = jnp.max(logits, axis=-1, keepdims=True)                   # (R, 1)
    z = logits - m
    lse = jnp.log(jnp.sum(jnp.exp(z), axis=-1, keepdims=True)) + m
    tgt = tgt_ref[...]                                            # (R, 1)
    picked = jnp.sum(jnp.where(tgt == col, logits, 0.0),
                     axis=-1, keepdims=True)                      # (R, 1)

    row = (pl.program_id(0) * R
           + jax.lax.broadcasted_iota(jnp.int32, (R, 1), 0))      # global row id
    valid = row < n_valid_rows
    loss_ref[...] = jnp.where(valid, lse - picked, 0.0)


def _choose_tile(BT, T):
    # rows per grid step: multiple of T (pos broadcast) and of 8 (sublanes),
    # capped at 256 (fully occupies the MXU; 2 passes on v5e's 128-tall array)
    base = (T * 8) // math.gcd(T, 8)
    return max(base, (min(256, BT) // base) * base)


def bigram_forward(idx, targets, params):
    """idx, targets: (B, T) int32. Returns (logits (B*T, vocab), loss scalar)."""
    tok_pad, pos_bf, w_pad, b_pad = params      # prepared / padded params
    B, T = idx.shape
    BT = B * T

    tile = _choose_tile(BT, T)
    num_tiles = -(-BT // tile)
    BT_pad = num_tiles * tile

    idx_flat = idx.reshape(BT, 1).astype(jnp.int32)
    tgt_flat = targets.reshape(BT, 1).astype(jnp.int32)
    if BT_pad != BT:
        pad = BT_pad - BT
        idx_flat = jnp.concatenate([idx_flat, jnp.zeros((pad, 1), jnp.int32)], 0)
        tgt_flat = jnp.concatenate([tgt_flat, jnp.zeros((pad, 1), jnp.int32)], 0)

    pos_slice = pos_bf[:T]                                        # (T, C)
    kernel = functools.partial(bigram_kernel, n_valid_rows=BT)

    logits_pad, per_row_loss = pl.pallas_call(
        kernel,
        out_shape=(
            jax.ShapeDtypeStruct((BT_pad, V_PAD), jnp.float32),
            jax.ShapeDtypeStruct((BT_pad, 1), jnp.float32),
        ),
        grid_spec=pltpu.PrefetchScalarGridSpec(
            num_scalar_prefetch=0,
            grid=(num_tiles,),
            in_specs=[
                pl.BlockSpec((tile, 1), lambda i: (i, 0)),         # idx (tiled)
                pl.BlockSpec((tile, 1), lambda i: (i, 0)),         # targets (tiled)
                pl.BlockSpec((V_PAD, n_embd), lambda i: (0, 0)),   # tok table (resident)
                pl.BlockSpec((T, n_embd), lambda i: (0, 0)),       # pos table (resident)
                pl.BlockSpec((n_embd, V_PAD), lambda i: (0, 0)),   # lm_head W (resident)
                pl.BlockSpec((1, V_PAD), lambda i: (0, 0)),        # lm_head b (resident)
            ],
            out_specs=(
                pl.BlockSpec((tile, V_PAD), lambda i: (i, 0)),     # logits (lane-dense)
                pl.BlockSpec((tile, 1), lambda i: (i, 0)),         # per-row loss
            ),
        ),
        compiler_params=pltpu.CompilerParams(
            dimension_semantics=("parallel",)),
    )(idx_flat, tgt_flat, tok_pad, pos_slice, w_pad, b_pad)

    logits = logits_pad[:BT, :vocab_size]
    loss = jnp.sum(per_row_loss) / BT                              # padded rows are 0
    return logits, loss


def init_params(key):
    """Torch-like f32 parameters."""
    k1, k2, k3, k4 = jax.random.split(key, 4)
    tok_table = jax.random.normal(k1, (vocab_size, n_embd), jnp.float32)   # N(0,1)
    pos_table = jax.random.normal(k2, (block_size, n_embd), jnp.float32)
    bound = 1.0 / (n_embd ** 0.5)
    w = jax.random.uniform(k3, (n_embd, vocab_size), jnp.float32, -bound, bound)
    b = jax.random.uniform(k4, (vocab_size,), jnp.float32, -bound, bound)
    return tok_table, pos_table, w, b


def prepare_params(tok_table, pos_table, w, b):
    """Pad vocab dim to 128 lanes and store tables/weights in bf16 (bias stays f32)."""
    tok_pad = jnp.zeros((V_PAD, n_embd), jnp.float32).at[:vocab_size].set(tok_table)
    w_pad = jnp.zeros((n_embd, V_PAD), jnp.float32).at[:, :vocab_size].set(w)
    b_pad = jnp.full((1, V_PAD), NEG_INF, jnp.float32).at[0, :vocab_size].set(b)
    return (tok_pad.astype(jnp.bfloat16),
            pos_table.astype(jnp.bfloat16),
            w_pad.astype(jnp.bfloat16),
            b_pad)


def reference_forward(idx, targets, params_f32):
    """Pure-JAX reference that mirrors the kernel's bf16 parameter storage."""
    tok, pos, w, b = params_f32
    tok_bf = tok.astype(jnp.bfloat16).astype(jnp.float32)
    pos_bf = pos.astype(jnp.bfloat16).astype(jnp.float32)
    w_bf = w.astype(jnp.bfloat16).astype(jnp.float32)
    B, T = idx.shape
    x = tok_bf[idx] + pos_bf[:T][None]                             # (B, T, C)
    x = x.astype(jnp.bfloat16).astype(jnp.float32)                 # matches kernel cast
    logits = x @ w_bf + b                                          # (B, T, V)
    logits = logits.reshape(B * T, -1)
    tgt = targets.reshape(B * T)
    lse = jax.nn.logsumexp(logits, axis=-1)
    picked = jnp.take_along_axis(logits, tgt[:, None], axis=-1)[:, 0]
    return logits, jnp.mean(lse - picked)


if __name__ == "__main__":
    key = jax.random.PRNGKey(0)
    pkey, ikey, tkey, ikey2, tkey2 = jax.random.split(key, 5)
    params_f32 = init_params(pkey)
    params = prepare_params(*params_f32)

    # small-shape check (B=2, T=block_size) -> single-tile grid
    B, T = 2, block_size
    idx = jax.random.randint(ikey, (B, T), 0, vocab_size, dtype=jnp.int32)
    targets = jax.random.randint(tkey, (B, T), 0, vocab_size, dtype=jnp.int32)
    logits, loss = bigram_forward(idx, targets, params)
    jax.block_until_ready((logits, loss))
    ref_logits, ref_loss = reference_forward(idx, targets, params_f32)
    assert jnp.allclose(logits, ref_logits, atol=1e-3, rtol=1e-3), "logits mismatch (small)"
    assert jnp.allclose(loss, ref_loss, atol=1e-3, rtol=1e-3), "loss mismatch (small)"

    # larger batch: B*T = 512 -> two 256-row tiles, exercises the parallel row grid
    B2 = 64
    idx2 = jax.random.randint(ikey2, (B2, T), 0, vocab_size, dtype=jnp.int32)
    targets2 = jax.random.randint(tkey2, (B2, T), 0, vocab_size, dtype=jnp.int32)
    logits2, loss2 = bigram_forward(idx2, targets2, params)
    jax.block_until_ready((logits2, loss2))
    ref_logits2, ref_loss2 = reference_forward(idx2, targets2, params_f32)
    assert jnp.allclose(logits2, ref_logits2, atol=1e-3, rtol=1e-3), "logits mismatch (large)"
    assert jnp.allclose(loss2, ref_loss2, atol=1e-3, rtol=1e-3), "loss mismatch (large)"

    # TODO(synk): generate() (autoregressive multinomial sampling loop) is host-side
    # control flow around this forward; not implemented as a kernel.
    print("KERNEL_OK")
</pallas_src>

<mosaic_0001>
module attributes {stable_mosaic.version = 11 : i64} {
  func.func @bigram_kernel(%arg0: i32, %arg1: memref<16x1xi32, #tpu.memory_space<vmem>>, %arg2: memref<16x1xi32, #tpu.memory_space<vmem>>, %arg3: memref<128x32xbf16, #tpu.memory_space<vmem>>, %arg4: memref<8x32xbf16, #tpu.memory_space<vmem>>, %arg5: memref<32x128xbf16, #tpu.memory_space<vmem>>, %arg6: memref<1x128xf32, #tpu.memory_space<vmem>>, %arg7: memref<16x128xf32, #tpu.memory_space<vmem>>, %arg8: memref<16x1xf32, #tpu.memory_space<vmem>>) attributes {dimension_semantics = [#tpu.dimension_semantics<parallel>], iteration_bounds = array<i64: 1>, scalar_prefetch = 0 : i64, scratch_operands = 0 : i64, tpu.core_type = #tpu.core_type<tc>, window_params = [{transform_indices = @transform_0, window_bounds = array<i64: 16, 1>}, {transform_indices = @transform_1, window_bounds = array<i64: 16, 1>}, {pipeline_mode = #tpu.pipeline_mode<synchronous>, transform_indices = @transform_2, window_bounds = array<i64: 128, 32>}, {pipeline_mode = #tpu.pipeline_mode<synchronous>, transform_indices = @transform_3, window_bounds = array<i64: 8, 32>}, {pipeline_mode = #tpu.pipeline_mode<synchronous>, transform_indices = @transform_4, window_bounds = array<i64: 32, 128>}, {pipeline_mode = #tpu.pipeline_mode<synchronous>, transform_indices = @transform_5, window_bounds = array<i64: 1, 128>}, {transform_indices = @transform_6, window_bounds = array<i64: 16, 128>}, {transform_indices = @transform_7, window_bounds = array<i64: 16, 1>}]} {
    %c0 = arith.constant 0 : index
    %c0_0 = arith.constant 0 : index
    %0 = vector.load %arg1[%c0, %c0_0] : memref<16x1xi32, #tpu.memory_space<vmem>>, vector<16x1xi32>
    %1 = tpu.iota {dimensions = array<i32: 1>} : vector<16x128xi32>
    %2 = vector.broadcast %0 : vector<16x1xi32> to vector<16x128xi32>
    %3 = arith.cmpi eq, %2, %1 : vector<16x128xi32>
    %4 = arith.extui %3 : vector<16x128xi1> to vector<16x128xi32>
    %5 = arith.sitofp %4 : vector<16x128xi32> to vector<16x128xf32>
    %6 = arith.truncf %5 : vector<16x128xf32> to vector<16x128xbf16>
    %c0_1 = arith.constant 0 : index
    %c0_2 = arith.constant 0 : index
    %7 = vector.load %arg3[%c0_1, %c0_2] : memref<128x32xbf16, #tpu.memory_space<vmem>>, vector<128x32xbf16>
    %cst = arith.constant dense<0.000000e+00> : vector<16x32xf32>
    %8 = tpu.matmul %6, %7, %cst {dimension_numbers = #tpu.dot_dimension_numbers<[1], [0], [0], [1], [0, 0, 1, 1], [], []>} : vector<16x128xbf16>, vector<128x32xbf16>, vector<16x32xf32> -> vector<16x32xf32>
    %c0_3 = arith.constant 0 : index
    %c0_4 = arith.constant 0 : index
    %9 = vector.load %arg4[%c0_3, %c0_4] : memref<8x32xbf16, #tpu.memory_space<vmem>>, vector<8x32xbf16>
    %10 = arith.extf %9 : vector<8x32xbf16> to vector<8x32xf32>
    %11 = vector.shape_cast %8 : vector<16x32xf32> to vector<2x8x32xf32>
    %12 = vector.shape_cast %10 : vector<8x32xf32> to vector<1x8x32xf32>
    %13 = vector.broadcast %12 : vector<1x8x32xf32> to vector<2x8x32xf32>
    %14 = arith.addf %11, %13 : vector<2x8x32xf32>
    %15 = vector.shape_cast %14 : vector<2x8x32xf32> to vector<16x32xf32>
    %16 = arith.truncf %15 : vector<16x32xf32> to vector<16x32xbf16>
    %c0_5 = arith.constant 0 : index
    %c0_6 = arith.constant 0 : index
    %17 = vector.load %arg5[%c0_5, %c0_6] : memref<32x128xbf16, #tpu.memory_space<vmem>>, vector<32x128xbf16>
    %cst_7 = arith.constant dense<0.000000e+00> : vector<16x128xf32>
    %18 = tpu.matmul %16, %17, %cst_7 {dimension_numbers = #tpu.dot_dimension_numbers<[1], [0], [0], [1], [0, 0, 1, 1], [], []>} : vector<16x32xbf16>, vector<32x128xbf16>, vector<16x128xf32> -> vector<16x128xf32>
    %c0_8 = arith.constant 0 : index
    %c0_9 = arith.constant 0 : index
    %19 = vector.load %arg6[%c0_8, %c0_9] : memref<1x128xf32, #tpu.memory_space<vmem>>, vector<1x128xf32>
    %20 = vector.broadcast %19 : vector<1x128xf32> to vector<16x128xf32>
    %21 = arith.addf %18, %20 : vector<16x128xf32>
    %c0_10 = arith.constant 0 : index
    %c0_11 = arith.constant 0 : index
    %22 = vector.load %arg7[%c0_10, %c0_11] : memref<16x128xf32, #tpu.memory_space<vmem>>, vector<16x128xf32>
    tpu.vector_store %arg7[%c0_10, %c0_11], %21 {strides = array<i32>} : memref<16x128xf32, #tpu.memory_space<vmem>>, vector<16x128xf32>,
    %cst_12 = arith.constant dense<0xFF800000> : vector<16xf32>
    %23 = vector.multi_reduction <maximumf>, %21, %cst_12 [1] : vector<16x128xf32> to vector<16xf32>
    %24 = vector.shape_cast %23 : vector<16xf32> to vector<16x1xf32>
    %25 = vector.broadcast %24 : vector<16x1xf32> to vector<16x128xf32>
    %26 = arith.subf %21, %25 : vector<16x128xf32>
    %27 = math.exp %26 : vector<16x128xf32>
    %cst_13 = arith.constant dense<0.000000e+00> : vector<16xf32>
    %28 = vector.multi_reduction <add>, %27, %cst_13 [1] : vector<16x128xf32> to vector<16xf32>
    %29 = vector.shape_cast %28 : vector<16xf32> to vector<16x1xf32>
    %30 = math.log %29 : vector<16x1xf32>
    %31 = arith.addf %30, %24 : vector<16x1xf32>
    %c0_14 = arith.constant 0 : index
    %c0_15 = arith.constant 0 : index
    %32 = vector.load %arg2[%c0_14, %c0_15] : memref<16x1xi32, #tpu.memory_space<vmem>>, vector<16x1xi32>
    %33 = vector.broadcast %32 : vector<16x1xi32> to vector<16x128xi32>
    %34 = arith.cmpi eq, %33, %1 : vector<16x128xi32>
    %cst_16 = arith.constant 0.000000e+00 : f32
    %35 = vector.broadcast %cst_16 : f32 to vector<16x128xf32>
    %36 = arith.select %34, %21, %35 : vector<16x128xi1>, vector<16x128xf32>
    %cst_17 = arith.constant dense<0.000000e+00> : vector<16xf32>
    %37 = vector.multi_reduction <add>, %36, %cst_17 [1] : vector<16x128xf32> to vector<16xf32>
    %38 = vector.shape_cast %37 : vector<16xf32> to vector<16x1xf32>
    %c16_i32 = arith.constant 16 : i32
    %39 = arith.muli %arg0, %c16_i32 : i32
    %40 = tpu.iota {dimensions = array<i32: 0>} : vector<16x1xi32>
    %41 = vector.broadcast %39 : i32 to vector<16x1xi32>
    %42 = arith.addi %41, %40 : vector<16x1xi32>
    %c16_i32_18 = arith.constant 16 : i32
    %43 = vector.broadcast %c16_i32_18 : i32 to vector<16x1xi32>
    %44 = arith.cmpi slt, %42, %43 : vector<16x1xi32>
    %45 = arith.subf %31, %38 : vector<16x1xf32>
    %cst_19 = arith.constant 0.000000e+00 : f32
    %46 = vector.broadcast %cst_19 : f32 to vector<16x1xf32>
    %47 = arith.select %44, %45, %46 : vector<16x1xi1>, vector<16x1xf32>
    %c0_20 = arith.constant 0 : index
    %c0_21 = arith.constant 0 : index
    %48 = vector.load %arg8[%c0_20, %c0_21] : memref<16x1xf32, #tpu.memory_space<vmem>>, vector<16x1xf32>
    tpu.vector_store %arg8[%c0_20, %c0_21], %47 {strides = array<i32>} : memref<16x1xf32, #tpu.memory_space<vmem>>, vector<16x1xf32>,
    return
  }
  func.func @transform_0(%arg0: i32) -> (i32, i32) {
    %c0_i32 = arith.constant 0 : i32
    %c0_i32_0 = arith.constant 0 : i32
    return %arg0, %c0_i32 : i32, i32
  }
  func.func @transform_1(%arg0: i32) -> (i32, i32) {
    %c0_i32 = arith.constant 0 : i32
    %c0_i32_0 = arith.constant 0 : i32
    return %arg0, %c0_i32 : i32, i32
  }
  func.func @transform_2(%arg0: i32) -> (i32, i32) {
    %c0_i32 = arith.constant 0 : i32
    %c0_i32_0 = arith.constant 0 : i32
    %c0_i32_1 = arith.constant 0 : i32
    return %c0_i32, %c0_i32_0 : i32, i32
  }
  func.func @transform_3(%arg0: i32) -> (i32, i32) {
    %c0_i32 = arith.constant 0 : i32
    %c0_i32_0 = arith.constant 0 : i32
    %c0_i32_1 = arith.constant 0 : i32
    return %c0_i32, %c0_i32_0 : i32, i32
  }
  func.func @transform_4(%arg0: i32) -> (i32, i32) {
    %c0_i32 = arith.constant 0 : i32
    %c0_i32_0 = arith.constant 0 : i32
    %c0_i32_1 = arith.constant 0 : i32
    return %c0_i32, %c0_i32_0 : i32, i32
  }
  func.func @transform_5(%arg0: i32) -> (i32, i32) {
    %c0_i32 = arith.constant 0 : i32
    %c0_i32_0 = arith.constant 0 : i32
    %c0_i32_1 = arith.constant 0 : i32
    return %c0_i32, %c0_i32_0 : i32, i32
  }
  func.func @transform_6(%arg0: i32) -> (i32, i32) {
    %c0_i32 = arith.constant 0 : i32
    %c0_i32_0 = arith.constant 0 : i32
    return %arg0, %c0_i32 : i32, i32
  }
  func.func @transform_7(%arg0: i32) -> (i32, i32) {
    %c0_i32 = arith.constant 0 : i32
    %c0_i32_0 = arith.constant 0 : i32
    return %arg0, %c0_i32 : i32, i32
  }
}

</mosaic_0001>

<bundles_post_ra>
// kernel: tpu_custom_call.1
= control target key start
LH: loop header
LB: loop body
LE: loop exit
PB: predicated region body
PF: predicated region fallthrough
CT: control target
= control target key end

     0   :  { %v401_v1 = vmov 0   ;;  %v402_v2 = vmov 0.0   ;;  %vm403_vm0 = vmmov 0   ;;  %s505_s0 = inlined_call_operand.vmem [shape: s32[16,1], index: 0, kind: input, shape index: {}]   ;;  %s506_s1 = inlined_call_operand.vmem [shape: s32[16,1], index: 1, kind: input, shape index: {}]   ;;  %s507_s2 = inlined_call_operand.vmem [shape: bf16[128,32], index: 2, kind: input, shape index: {}]   ;;  %s508_s3 = inlined_call_operand.vmem [shape: bf16[8,32], index: 3, kind: input, shape index: {}]   ;;  %s509_s4 = inlined_call_operand.vmem [shape: bf16[32,128], index: 4, kind: input, shape index: {}]   ;;  %s510_s5 = inlined_call_operand.vmem [shape: f32[1,128], index: 5, kind: input, shape index: {}]   ;;  %s511_s6 = inlined_call_operand.hbm [shape: f32[16,128], index: 6, kind: output, shape index: {0}]   ;;  %s512_s7 = inlined_call_operand.vmem [shape: f32[16,1], index: 7, kind: output, shape index: {1}]  }
   0x1   :  { %v27_v0 = vld [vmem:[%s505_s0] sm:$0xff]  ;;  %359 = vset.pattern.permute.xlu0 %v401_v1  ;;  %324 = vmatprep.subr.bf16.mxu0 %v402_v2  ;;  %v361_v3 = vld [vmem:[%s507_s2 + $0x38] sm:$0xff]   ;;  %v28_v4 = vld [vmem:[%s505_s0 + $0x8] sm:$0xff] }
   0x2   :  { %32 = vperm.xlu0 %359, %v27_v0   ;;  %344 = vmatprep.subr.bf16.mxu1 %v402_v2  ;;  %v362_v5 = vld [vmem:[%s507_s2 + $0x30] sm:$0xff]   ;;  %v244_v6 = vld [vmem:[%s506_s1] sm:$0xff]  ;;  %v363_v7 = vld [vmem:[%s507_s2 + $0x28] sm:$0xff]  }
   0x3   :  { %325 = vmatpush3.bf16.msra.mxu0 %v361_v3  ;;  %360 = vset.pattern.permute.xlu1 %v401_v1 }
   0x4   :  { %326 = vmatprep.subr.bf16.mxu0 %v402_v2  ;;  %340 = vmatprep.mubr.msk.bf16.mxu0 %vm403_vm0, %v402_v2 }
   0x5   :  { %348 = vmatprep.mubr.msk.bf16.mxu1 %vm403_vm0, %v402_v2 }
   0x6   :  { %35 = vperm.xlu0 %359, %v28_v4  }
   0x7   :  { %327 = vmatpush3.bf16.msra.mxu0 %v362_v5 }
   0x8   :  { %328 = vmatprep.subr.bf16.mxu0 %v402_v2 }
   0xa   :  { %247 = vperm.xlu0 %359, %v244_v6  }
   0xb   :  { %13 = vsyncpa [#allocation3], 0  ;;  %329 = vmatpush3.bf16.msra.mxu0 %v363_v7  ;;  %v364_v8 = vld [vmem:[%s507_s2 + $0x20] sm:$0xff]   ;;  %v365_v9 = vld [vmem:[%s507_s2 + $0x18] sm:$0xff]   ;;  %v29_v13 = vlaneseq  ;;  %v404_v17 = vmov 1.0|1.0  }
   0xc   :  { %330 = vmatprep.subr.bf16.mxu0 %v402_v2  ;;  %v366_v10 = vld [vmem:[%s507_s2 + $0x10] sm:$0xff]   ;;  %v367_v11 = vld [vmem:[%s507_s2 + $0x8] sm:$0xff]   ;;  %v368_v12 = vld [vmem:[%s507_s2] sm:$0xff]   ;;  %vm177_vm4 = vcmask 261120  }
   0xd   :  { %v30_v15 = vand.u32 127, %v29_v13  ;;  %v369_v18 = vld [vmem:[%s509_s4 + $0x8] sm:$0xff]   ;;  %v370_v19 = vld [vmem:[%s509_s4] sm:$0xff]  }
   0xe   :  { %345 = vmatpush3.bf16.msra.mxu1 %v369_v18  ;;  %v149_v20 = vld [vmem:[%s508_s3] sm:$0xf]  ;;  %v245_v36 = vld [vmem:[%s506_s1 + $0x8] sm:$0xff]  ;;  %s405_s1 = smov [#allocation2]  }
   0xf   :  { %331 = vmatpush3.bf16.msra.mxu0 %v364_v8  ;;  %346 = vmatprep.subr.bf16.mxu1 %v402_v2  ;;  %v150_v22 = vunpack.c.l.bf16 %v149_v20  ;;  %v308_v29 = vld [vmem:[%s510_s5] ss:$0 sm:$0xff]  ;;  %s281_s5 = sshll.u32 %s405_s1, 4  ;;  %s282_s5 = int_to_ptr.vmem [resolvable:$true] %s281_s5 }
  0x10   :  { %332 = vmatprep.subr.bf16.mxu0 %v402_v2  ;;  %s379_s29 = scalar_lea.vmem %s282_s5, 256  ;;  %p384_p1 = scmp.lt.s32.totalorder %s282_s5, %s282_s5 }
  0x11   :  { %p380_p0 = scmp.ne.s32.totalorder %s282_s5, %s379_s29  ;;  %p385_p2 = scmp.lt.s32.totalorder %s379_s29, %s379_s29 }
  0x12   :  { %347 = vmatpush3.bf16.msra.mxu1 %v370_v19 }
  0x13   :  { %333 = vmatpush3.bf16.msra.mxu0 %v365_v9  ;;  %p386_p3 = por %p385_p2, %p384_p1 }
  0x14   :  { %334 = vmatprep.subr.bf16.mxu0 %v402_v2 }
  0x15   :  { %p387_p4 = pnand %p386_p3, %p380_p0 }
  0x17   :  { %335 = vmatpush3.bf16.msra.mxu0 %v366_v10 }
  0x18   :  { %336 = vmatprep.subr.bf16.mxu0 %v402_v2 }
  0x1b   :  { %337 = vmatpush3.bf16.msra.mxu0 %v367_v11 }
  0x1c   :  { %338 = vmatprep.subr.bf16.mxu0 %v402_v2 }
  0x1f   :  { %339 = vmatpush3.bf16.msra.mxu0 %v368_v12 }
  0x7d   :  { %v33_v14 = vpop.permute.xlu0 %32 }
  0x7e   :  { %vm37_vm1 = vcmp.eq.s32.totalorder %v33_v14, %v30_v15 }
  0x81   :  { %v36_v16 = vpop.permute.xlu0 %35 }
  0x82   :  { %vm38_vm2 = vcmp.eq.s32.totalorder %v36_v16, %v30_v15 }
  0x83   :  { %vm306_vm3 = vmpackc.low %vm38_vm2, %vm37_vm1 }
  0x84   :  { %341 = vmatmul.mubr.msk.bf16.vlgmr.msra.gmra.mxu0 %vm306_vm3, %v404_v17 }
  0x85   :  { %v248_v44 = vpop.permute.xlu0 %247 }
  0x86   :  { %vm252_vm5 = vcmp.eq.s32.totalorder %v248_v44, %v30_v15 }
 0x144   :  { %v142_v21 = vpop.f32.mrf.mxu0 }
 0x145   :  { %v151_v25 = vadd.f32 %v150_v22, %v142_v21 }
 0x146   :  { %v342_v23 = vpop.f32.mrf.mxu0 }
 0x148   :  { %v145_v24 = vpop.f32.mrf.mxu0 }
 0x149   :  { %v152_v26 = vadd.f32 %v150_v22, %v145_v24 }
 0x14a   :  { %v343_v27 = vpop.f32.mrf.mxu0 }
 0x14b   :  { %v153_v28 = vpack.c.bf16 %v152_v26, %v151_v25 }
 0x14d   :  { %349 = vmatmul.mubr.msk.bf16.vlgmr.msra.gmra.mxu1 %vm177_vm4, %v153_v28 }
 0x20d   :  { %v215_v30 = vpop.f32.mrf.mxu1 }
 0x20e   :  { %v216_v31 = vadd.f32 %v308_v29, %v215_v30 }
 0x20f   :  { %v350_v32 = vpop.f32.mrf.mxu1 }
 0x210   :  { %222 = vst [vmem:[#allocation2] sm:$0xff] %v216_v31  ;;  %224 = vmax.xlane.f32.xlu1 %v216_v31  ;;  %v254_v47 = vsel %vm252_vm5, %v216_v31, 0.0 }
 0x211   :  { %v218_v33 = vpop.f32.mrf.mxu1 }
 0x212   :  { %v219_v34 = vadd.f32 %v308_v29, %v218_v33 }
 0x213   :  { %v351_v35 = vpop.f32.mrf.mxu1 }
 0x214   :  { %223 = vst [vmem:[#allocation2 + $0x8] sm:$0xff] %v219_v34  ;;  %226 = vmax.xlane.f32.xlu1 %v219_v34 }
 0x225   :  { %250 = vperm.xlu1 %360, %v245_v36  }
 0x299   :  { %v225_v37 = vpop.xlane.xlu1 %224 }
 0x29a   :  { %v228_v38 = vsub.f32 %v216_v31, %v225_v37 }
 0x29c   :  { %v230_v39 = vmul.f32 1.442695, %v228_v38 }
 0x29d   :  { %v227_v40 = vpop.xlane.xlu1 %226 }
 0x29e   :  { %371 = vpow2.f32 %v230_v39  ;;  %v229_v41 = vsub.f32 %v219_v34, %v227_v40 }
 0x2a0   :  { %v232_v42 = vmul.f32 1.442695, %v229_v41 }
 0x2a1   :  { %v251_v45 = vpop.permute.xlu1 %250 }
 0x2a2   :  { %373 = vpow2.f32 %v232_v42  ;;  %vm253_vm6 = vcmp.eq.s32.totalorder %v251_v45, %v30_v15 }
 0x2a3   :  { %v255_v48 = vsel %vm253_vm6, %v219_v34, 0.0 }
 0x2ab   :  { %v372_v43 = vpop.eup %371 }
 0x2ac   :  { %234 = vadd.xlane.f32.xlu0 %v372_v43 }
 0x2af   :  { %v374_v46 = vpop.eup %373 }
 0x2b0   :  { %236 = vadd.xlane.f32.xlu1 %v374_v46  ;;  %256 = vadd.xlane.f32.xlu0 %v254_v47 }
 0x2b4   :  { %258 = vadd.xlane.f32.xlu0 %v255_v48 }
 0x2b5   :  { %390 = shalt.err (!%p387_p4)
}
 0x2b6   :  { %s406_s30 = smov 128   ;;  %s407_s8 = smov 8   ;;  %vm273_vm7 = vcmask 7168  }
 0x2b7   :  { %287 = dma.vmem_to_hbm [thread:$0]  %s282_s5, 256, %s511_s6, [#allocation3], %s406_s30, %s406_s30, %s407_s8  }
 0x335   :  { %v235_v49 = vpop.xlane.xlu0 %234 }
 0x336   :  { %375 = vlog2.f32 %v235_v49 }
 0x339   :  { %v237_v50 = vpop.xlane.xlu1 %236  ;;  %v257_v53 = vpop.xlane.xlu0 %256 }
 0x33a   :  { %377 = vlog2.f32 %v237_v50 }
 0x33d   :  { %v259_v59 = vpop.xlane.xlu0 %258 }
 0x343   :  { %v376_v51 = vpop.eup %375 }
 0x344   :  { %v239_v52 = vmul.f32 0.6931472, %v376_v51 }
 0x346   :  { %v242_v54 = vadd.f32 %v239_v52, %v225_v37 }
 0x347   :  { %v378_v55 = vpop.eup %377 }
 0x348   :  { %v241_v56 = vmul.f32 0.6931472, %v378_v55  ;;  %v269_v57 = vsub.f32 %v242_v54, %v257_v53 }
 0x34a   :  { %274 = vst.msk [vmem:[%s512_s7] sm:$0xff] %vm273_vm7, %v269_v57  ;;  %v243_v58 = vadd.f32 %v241_v56, %v227_v40 }
 0x34c   :  { %v270_v60 = vsub.f32 %v243_v58, %v259_v59 }
 0x34e   :  { %275 = vst.msk [vmem:[%s512_s7 + $0x8] sm:$0xff] %vm273_vm7, %v270_v60 }
 0x34f   :  { %399 = dma.done.wait [#allocation3], 256  }
 0x350   :  { %400 = vsyncadd [#allocation3], 4294967040 }
 0x351   :  { %295 = vsyncpa [#allocation3], 1 }

</bundles_post_ra>
